<compile_context>
chip_gen: v7x
topology: tpu7x:2x2x1
jax: 0.10.0
libtpu: 0.0.40
codegen_flags: <defaults>
</compile_context>

<pallas_src>
import jax
import jax.numpy as jnp
from jax.experimental import pallas as pl
from jax.experimental.pallas import tpu as pltpu


# ----------------------------- Phase 1 kernel ------------------------------ #
def linear1_stats_kernel(x_ref, w1_ref, s1_ref, s2_ref):
    """Per-tile partial BN statistics of h = x_tile @ W1 (bf16 MXU, f32 acc)."""
    h = jnp.dot(x_ref[...], w1_ref[...], preferred_element_type=jnp.float32)
    # Single reduction pass: sum and sum-of-squares together.
    s1_ref[...] = jnp.sum(h, axis=0, keepdims=True)[None]        # (1, 1, hidden)
    s2_ref[...] = jnp.sum(h * h, axis=0, keepdims=True)[None]    # (1, 1, hidden)


# ----------------------------- Phase 2 kernel ------------------------------ #
def bn_relu_linear2_kernel(scale_ref, shift_ref, b2_ref, x_ref, w1_ref, w2_ref, o_ref):
    """Recompute h = x @ W1, apply folded BN scale/shift + ReLU, then h @ W2 + b2."""
    h = jnp.dot(x_ref[...], w1_ref[...], preferred_element_type=jnp.float32)
    h = h * scale_ref[...] + shift_ref[...]                       # BN folded (f32 VPU)
    h = jnp.maximum(h, 0.0)                                       # ReLU
    out = jnp.dot(h.astype(jnp.bfloat16), w2_ref[...],
                  preferred_element_type=jnp.float32)             # (tile_n, out_dim)
    o_ref[...] = (out + b2_ref[...]).astype(o_ref.dtype)


# -------------------------------- Wrapper ---------------------------------- #
def prediction_mlp(x, w1, b1, gamma, beta, w2, b2, *, tile_n=256, eps=1e-5):
    """x: (N, in_dim); w1: (in_dim, hidden); w2: (hidden, out_dim).

    b1 is accepted for API parity with the PyTorch module but intentionally unused:
    a per-feature bias before training-mode BatchNorm1d is exactly cancelled by the
    batch-mean subtraction.
    """
    del b1
    N, in_dim = x.shape
    hidden = w1.shape[1]
    out_dim = w2.shape[1]

    if N % tile_n != 0:
        tile_n = N                       # single-block fallback for ragged batches
    n_tiles = N // tile_n

    # bf16 operands for the MXU (halves weight/activation DMA, 2x MXU throughput);
    # accumulation stays f32 via preferred_element_type.
    xb = x.astype(jnp.bfloat16)
    w1b = w1.astype(jnp.bfloat16)
    w2b = w2.astype(jnp.bfloat16)

    # ---- Phase 1: per-tile partial BN statistics (fully parallel over tiles) ----
    s1p, s2p = pl.pallas_call(
        linear1_stats_kernel,
        out_shape=(jax.ShapeDtypeStruct((n_tiles, 1, hidden), jnp.float32),
                   jax.ShapeDtypeStruct((n_tiles, 1, hidden), jnp.float32)),
        grid=(n_tiles,),
        in_specs=[pl.BlockSpec((tile_n, in_dim), lambda i: (i, 0)),
                  pl.BlockSpec((in_dim, hidden), lambda i: (0, 0))],   # W1 VMEM-resident
        out_specs=(pl.BlockSpec((1, 1, hidden), lambda i: (i, 0, 0)),
                   pl.BlockSpec((1, 1, hidden), lambda i: (i, 0, 0))),
        compiler_params=pltpu.CompilerParams(
            dimension_semantics=("parallel",)),                        # shard over TCs
    )(xb, w1b)

    # ---- Tiny O(hidden) stat fold (one small XLA fusion): BN -> scale/shift ----
    gamma_f = gamma.astype(jnp.float32).reshape(hidden)
    beta_f = beta.astype(jnp.float32).reshape(hidden)
    inv_n = 1.0 / N
    s1 = jnp.sum(s1p[:, 0, :], axis=0)                               # (hidden,)
    s2 = jnp.sum(s2p[:, 0, :], axis=0)                               # (hidden,)
    mean = s1 * inv_n
    var = jnp.maximum(s2 * inv_n - mean * mean, 0.0)                 # biased variance
    inv_std = jax.lax.rsqrt(var + eps)
    scale = (gamma_f * inv_std).reshape(1, hidden)
    shift = (beta_f - mean * gamma_f * inv_std).reshape(1, hidden)
    b2_2 = b2.astype(jnp.float32).reshape(1, out_dim)

    # ---- Phase 2: recompute Linear-1, BN(scale/shift) + ReLU + Linear-2 ----
    out = pl.pallas_call(
        bn_relu_linear2_kernel,
        out_shape=jax.ShapeDtypeStruct((N, out_dim), jnp.float32),
        grid=(n_tiles,),
        in_specs=[pl.BlockSpec((1, hidden), lambda i: (0, 0)),        # scale
                  pl.BlockSpec((1, hidden), lambda i: (0, 0)),        # shift
                  pl.BlockSpec((1, out_dim), lambda i: (0, 0)),       # b2
                  pl.BlockSpec((tile_n, in_dim), lambda i: (i, 0)),   # x tile
                  pl.BlockSpec((in_dim, hidden), lambda i: (0, 0)),   # W1 VMEM-resident
                  pl.BlockSpec((hidden, out_dim), lambda i: (0, 0))], # W2 VMEM-resident
        out_specs=pl.BlockSpec((tile_n, out_dim), lambda i: (i, 0)),
        compiler_params=pltpu.CompilerParams(
            dimension_semantics=("parallel",)),                       # shard over TCs
    )(scale, shift, b2_2, xb, w1b, w2b)

    return out


if __name__ == "__main__":
    # Small but tiling-exercising shapes consistent with the module's structure
    # (in_dim == out_dim, wider hidden); grid = 2 batch tiles of 128 rows.
    N, IN_DIM, HIDDEN, OUT_DIM = 256, 256, 512, 256

    key = jax.random.PRNGKey(0)
    kx, kw1, kb1, kw2, kb2 = jax.random.split(key, 5)

    x = jax.random.normal(kx, (N, IN_DIM), dtype=jnp.float32)

    lim1 = 1.0 / (IN_DIM ** 0.5)
    w1 = jax.random.uniform(kw1, (IN_DIM, HIDDEN), minval=-lim1, maxval=lim1,
                            dtype=jnp.float32)
    b1 = jax.random.uniform(kb1, (HIDDEN,), minval=-lim1, maxval=lim1,
                            dtype=jnp.float32)
    gamma = jnp.ones((HIDDEN,), jnp.float32)   # BatchNorm1d weight init
    beta = jnp.zeros((HIDDEN,), jnp.float32)   # BatchNorm1d bias init

    lim2 = 1.0 / (HIDDEN ** 0.5)
    w2 = jax.random.uniform(kw2, (HIDDEN, OUT_DIM), minval=-lim2, maxval=lim2,
                            dtype=jnp.float32)
    b2 = jax.random.uniform(kb2, (OUT_DIM,), minval=-lim2, maxval=lim2,
                            dtype=jnp.float32)

    out = prediction_mlp(x, w1, b1, gamma, beta, w2, b2, tile_n=128)
    out = jax.block_until_ready(out)

    # Mixed-precision JAX reference (same bf16 MXU operands, f32 accumulation,
    # f32 BN math).  Note it DOES add b1 — verifying the in-kernel cancellation.
    w1b = w1.astype(jnp.bfloat16)
    w2b = w2.astype(jnp.bfloat16)
    h_ref = jnp.dot(x.astype(jnp.bfloat16), w1b,
                    preferred_element_type=jnp.float32) + b1
    mu = h_ref.mean(axis=0, keepdims=True)
    var = ((h_ref - mu) ** 2).mean(axis=0, keepdims=True)
    h_ref = (h_ref - mu) / jnp.sqrt(var + 1e-5) * gamma + beta
    h_ref = jnp.maximum(h_ref, 0.0)
    ref = jnp.dot(h_ref.astype(jnp.bfloat16), w2b,
                  preferred_element_type=jnp.float32) + b2

    assert out.shape == (N, OUT_DIM)
    assert jnp.allclose(out, ref, atol=1e-2, rtol=1e-2), (
        float(jnp.max(jnp.abs(out - ref))))

    print("KERNEL_OK")
</pallas_src>

<mosaic_0001>
module attributes {stable_mosaic.version = 11 : i64} {
  func.func @linear1_stats_kernel(%arg0: i32, %arg1: memref<128x256xbf16, #tpu.memory_space<vmem>>, %arg2: memref<256x512xbf16, #tpu.memory_space<vmem>>, %arg3: memref<1x1x512xf32, #tpu.memory_space<vmem>>, %arg4: memref<1x1x512xf32, #tpu.memory_space<vmem>>) attributes {dimension_semantics = [#tpu.dimension_semantics<parallel>], iteration_bounds = array<i64: 2>, scalar_prefetch = 0 : i64, scratch_operands = 0 : i64, tpu.core_type = #tpu.core_type<tc>, window_params = [{transform_indices = @transform_0, window_bounds = array<i64: 128, 256>}, {pipeline_mode = #tpu.pipeline_mode<synchronous>, transform_indices = @transform_1, window_bounds = array<i64: 256, 512>}, {transform_indices = @transform_2, window_bounds = array<i64: 1, 1, 512>}, {transform_indices = @transform_3, window_bounds = array<i64: 1, 1, 512>}]} {
    %c0 = arith.constant 0 : index
    %c0_0 = arith.constant 0 : index
    %0 = vector.load %arg1[%c0, %c0_0] : memref<128x256xbf16, #tpu.memory_space<vmem>>, vector<128x256xbf16>
    %c0_1 = arith.constant 0 : index
    %c0_2 = arith.constant 0 : index
    %1 = vector.load %arg2[%c0_1, %c0_2] : memref<256x512xbf16, #tpu.memory_space<vmem>>, vector<256x512xbf16>
    %cst = arith.constant dense<0.000000e+00> : vector<128x512xf32>
    %2 = tpu.matmul %0, %1, %cst {dimension_numbers = #tpu.dot_dimension_numbers<[1], [0], [0], [1], [0, 0, 1, 1], [], []>} : vector<128x256xbf16>, vector<256x512xbf16>, vector<128x512xf32> -> vector<128x512xf32>
    %cst_3 = arith.constant dense<0.000000e+00> : vector<512xf32>
    %3 = vector.multi_reduction <add>, %2, %cst_3 [0] : vector<128x512xf32> to vector<512xf32>
    %4 = vector.shape_cast %3 : vector<512xf32> to vector<1x512xf32>
    %5 = vector.shape_cast %4 : vector<1x512xf32> to vector<1x1x512xf32>
    %c0_4 = arith.constant 0 : index
    %c0_5 = arith.constant 0 : index
    %c0_6 = arith.constant 0 : index
    %6 = vector.load %arg3[%c0_4, %c0_5, %c0_6] : memref<1x1x512xf32, #tpu.memory_space<vmem>>, vector<1x1x512xf32>
    tpu.vector_store %arg3[%c0_4, %c0_5, %c0_6], %5 {strides = array<i32>} : memref<1x1x512xf32, #tpu.memory_space<vmem>>, vector<1x1x512xf32>,
    %7 = arith.mulf %2, %2 : vector<128x512xf32>
    %cst_7 = arith.constant dense<0.000000e+00> : vector<512xf32>
    %8 = vector.multi_reduction <add>, %7, %cst_7 [0] : vector<128x512xf32> to vector<512xf32>
    %9 = vector.shape_cast %8 : vector<512xf32> to vector<1x512xf32>
    %10 = vector.shape_cast %9 : vector<1x512xf32> to vector<1x1x512xf32>
    %c0_8 = arith.constant 0 : index
    %c0_9 = arith.constant 0 : index
    %c0_10 = arith.constant 0 : index
    %11 = vector.load %arg4[%c0_8, %c0_9, %c0_10] : memref<1x1x512xf32, #tpu.memory_space<vmem>>, vector<1x1x512xf32>
    tpu.vector_store %arg4[%c0_8, %c0_9, %c0_10], %10 {strides = array<i32>} : memref<1x1x512xf32, #tpu.memory_space<vmem>>, vector<1x1x512xf32>,
    return
  }
  func.func @transform_0(%arg0: i32) -> (i32, i32) {
    %c0_i32 = arith.constant 0 : i32
    %c0_i32_0 = arith.constant 0 : i32
    return %arg0, %c0_i32 : i32, i32
  }
  func.func @transform_1(%arg0: i32) -> (i32, i32) {
    %c0_i32 = arith.constant 0 : i32
    %c0_i32_0 = arith.constant 0 : i32
    %c0_i32_1 = arith.constant 0 : i32
    return %c0_i32, %c0_i32_0 : i32, i32
  }
  func.func @transform_2(%arg0: i32) -> (i32, i32, i32) {
    %c0_i32 = arith.constant 0 : i32
    %c0_i32_0 = arith.constant 0 : i32
    %c0_i32_1 = arith.constant 0 : i32
    return %arg0, %c0_i32, %c0_i32_0 : i32, i32, i32
  }
  func.func @transform_3(%arg0: i32) -> (i32, i32, i32) {
    %c0_i32 = arith.constant 0 : i32
    %c0_i32_0 = arith.constant 0 : i32
    %c0_i32_1 = arith.constant 0 : i32
    return %arg0, %c0_i32, %c0_i32_0 : i32, i32, i32
  }
}

</mosaic_0001>

<bundles_post_ra>
// kernel: tpu_custom_call.1
= control target key start
LH: loop header
LB: loop body
LE: loop exit
PB: predicated region body
PF: predicated region fallthrough
CT: control target
= control target key end

     0   :  { %9 = vsyncpa [#allocation3], 0  ;;  %s2117_s0 = inlined_call_operand.hbm [shape: bf16[256,256], index: 0, kind: input, shape index: {}]   ;;  %s2118_s1 = inlined_call_operand.hbm [shape: bf16[256,512], index: 1, kind: input, shape index: {}]   ;;  %s2119_s2 = inlined_call_operand.hbm [shape: f32[2,1,512], index: 2, kind: output, shape index: {0}]   ;;  %s2120_s3 = inlined_call_operand.hbm [shape: f32[2,1,512], index: 3, kind: output, shape index: {1}]  }
   0x1   :  { %11 = vsyncpa [#allocation3 + $0x1], 0 }
   0x2   :  { %12 = vsyncpa [#allocation6], 0 }
   0x3   :  { %13 = vsyncpa [#allocation4], 0 }
   0x4   :  { %15 = vsyncpa [#allocation4 + $0x1], 0 }
   0x5   :  { %16 = vsyncpa [#allocation9], 0 }
   0x6   :  { %18 = vsyncpa [#allocation9 + $0x1], 0  ;;  %s1848_s12 = smov 0   ;;  %s1850_s13 = smov 0  }
   0x7   :  { %s1852_s14 = smov 0   ;;  %s1854_s15 = smov 0  }
   0x8 LB: > { %s1869_s16 = sadd.s32 4294967295, %s1817_s15   ;;  %s1365_s17 = sadd.s32 4294967294, %s1817_s15   ;;  %s1817_s15 = sphi %s1854_s15, %s2142_s15   ;;  %s1813_s14 = sphi %s1852_s14, %s2141_s14   ;;  %s1809_s13 = sphi %s1850_s13, %s2140_s13   ;;  %s1805_s12 = sphi %s1848_s12, %s2139_s12  }
   0x9   : > { %p44_p0 = scmp.ne.s32.totalorder %s1809_s13, %s1805_s12  ;;  %p2121_p1 = scmp.eq.s32.totalorder %s1869_s16, 0 }
   0xa   : > { %p95_p3 = scmp.eq.s32.totalorder %s1365_s17, 1  ;;  %p1366_p5 = scmp.ge.s32.totalorder %s1817_s15, 1 }
   0xb   : > { %p1878_p4 = por %p2121_p1, %p44_p0  ;;  %p128_p7 = scmp.lt.s32.totalorder %s1817_s15, 3 }
   0xc   : > { %p1883_p6 = por %p95_p3, %p44_p0  ;;  %s1819_s21 = smov [#allocation5]  }
   0xd   : > { %s2124_s18 = scalar_select %p1878_p4, 1, 0 }
   0xe   : > { %s2125_s19 = scalar_select %p1883_p6, 1, 0 }
   0xf   : > { %p1888_p8 = pnand %p1366_p5, %p128_p7  ;;  %s140_s22 = sshll.u32 %s1819_s21, 4  ;;  %s1892_s22 = int_to_ptr.vmem [resolvable:$true] %s140_s22 }
  0x10   : > { %s1904_s24 = sadd.s32 1, %s1817_s15   ;;  %s31_s25 = sadd.s32 1, %s1813_s14 }
  0x11   : > { %s2126_s20 = scalar_select %p1888_p8, 1, 0 }
  0x12   : > { %p1480_p9 = pneg %p1888_p8  ;;  %s28_s26 = ssub.s32 %s1817_s15, %s1904_s24 }
  0x13   : > { %s1657_s29 = scalar_lea.hbm %s2118_s1, 8192 }
  0x14   : > { %p1899_p11 = pnand %p1480_p9, %p2121_p1  ;;  %p1658_p12 = scmp.ne.s32.totalorder %s2118_s1, %s1657_s29 }
  0x15   : > { %p1664_p5 = scmp.lt.u32.totalorder %s1657_s29, %s2118_s1 }
  0x16   : > { %p1659_p13 = pneg %p1899_p11 }
  0x18   : > { %p1660_p0 = pnand %p1659_p13, %p1658_p12 }
  0x1a   : > { %p1661_p3 = pneg %p1660_p0 }
  0x1c   : > { %p1666_p7 = pnand %p1664_p5, %p1661_p3 }
  0x1e   : > { %1669 = shalt.err (!%p1666_p7)
}
  0x1f   : > { %s1670_s7 = scalar_lea.vmem %s1892_s22, 8192  ;;  %p1678_p2 = scmp.lt.s32.totalorder %s1892_s22, %s1892_s22 }
  0x20   : > { %p1671_p9 = scmp.ne.s32.totalorder %s1892_s22, %s1670_s7  ;;  %p1679_p6 = scmp.lt.s32.totalorder %s1670_s7, %s1670_s7 }
  0x22   : > { %p1673_p10 = pnand %p1671_p9, %p1659_p13  ;;  %p1680_p4 = por %p1679_p6, %p1678_p2 }
  0x24   : > { %p1674_p1 = pneg %p1673_p10 }
  0x26   : > { %p1681_p8 = pnand %p1680_p4, %p1674_p1 }
  0x28   : > { %1684 = shalt.err (!%p1681_p8)
}
  0x29   : > { %s1820_s8 = smov 256   ;;  %s1821_s9 = smov 16  }
  0x2a   : > { %1483 = dma.hbm_to_vmem [thread:$0]  (!%p1899_p11), %s2118_s1, 8192, %s1892_s22, [#allocation6], %s1820_s8, %s1820_s8, %s1821_s9  }
  0x2b   : > { %p29_p2 = scmp.eq.s32.totalorder %s28_s26, 0  ;;  %p38_p1 = scmp.ne.s32.totalorder %s1813_s14, %s1809_s13 }
  0x2c   : > { %p39_p4 = scmp.eq.s32.totalorder %s1817_s15, 0  ;;  %p1496_p6 = scmp.lt.s32.totalorder %s1817_s15, 2 }
  0x2d   : > { %s1935_s17 = scalar_select %p29_p2, %s1813_s14, %s31_s25  }
  0x2e   : > { %p40_p8 = por %p39_p4, %p38_p1  ;;  %p2128_p10 = scmp.eq.s32.totalorder %s1869_s16, 1 }
  0x2f   : > { %s154_s27 = sand.u32 1, %s1813_s14   ;;  %s1467_s28 = sshll.u32 %s1817_s15, 11 }
  0x30   : > { %p1939_p12 = por %p2128_p10, %p38_p1  ;;  %s1369_s29 = sshll.u32 %s154_s27, 7 }
  0x31   : > { %s1948_s4 = scalar_lea.hbm %s2117_s0, %s1467_s28  ;;  %s158_s22 = scalar_lea.vmem [#allocation2], %s1369_s29 }
  0x32   : > { %s166_s25 = sshll.u32 %s158_s22, 4  ;;  %p1950_p11 = pnand %p1496_p6, %p40_p8  ;;  %s1954_s25 = int_to_ptr.vmem [resolvable:$true] %s166_s25 }
  0x33   : > { %s1956_s5 = scalar_lea.sflag [#allocation3], %s154_s27  ;;  %s1685_s6 = scalar_lea.hbm %s1948_s4, 2048 }
  0x34   : > { %p1686_p13 = scmp.ne.s32.totalorder %s1948_s4, %s1685_s6  ;;  %p1687_p0 = pneg %p1950_p11 }
  0x35   : > { %s1690_s9 = scalar_lea.hbm %s2117_s0, 4096  ;;  %p1691_p7 = scmp.lt.u32.totalorder %s1948_s4, %s2117_s0 }
  0x36   : > { %p1688_p3 = pnand %p1687_p0, %p1686_p13  ;;  %p1692_p9 = scmp.lt.u32.totalorder %s1690_s9, %s1685_s6 }
  0x37   : > { %p1694_p1 = scmp.lt.u32.totalorder %s1685_s6, %s1948_s4 }
  0x38   : > { %p1689_p5 = pneg %p1688_p3  ;;  %p1693_p2 = por %p1692_p9, %p1691_p7 }
  0x3a   : > { %p1695_p4 = por %p1694_p1, %p1693_p2 }
  0x3c   : > { %p1696_p6 = pnand %p1695_p4, %p1689_p5 }
  0x3e   : > { %1699 = shalt.err (!%p1696_p6)
}
  0x3f   : > { %s1700_s27 = scalar_lea.vmem %s1954_s25, 2048  ;;  %s1822_s28 = smov [#allocation2]  }
  0x40   : > { %p1701_p8 = scmp.ne.s32.totalorder %s1954_s25, %s1700_s27  ;;  %s1705_s29 = sshll.u32 %s1822_s28, 4  ;;  %s1706_s29 = int_to_ptr.vmem [resolvable:$false] %s1705_s29 }
  0x41   : > { %s1707_s23 = scalar_lea.vmem %s1706_s29, 4096  ;;  %p1708_p3 = scmp.lt.s32.totalorder %s1954_s25, %s1706_s29 }
  0x42   : > { %p1703_p10 = pnand %p1701_p8, %p1687_p0  ;;  %p1709_p7 = scmp.lt.s32.totalorder %s1707_s23, %s1700_s27 }
  0x44   : > { %p1704_p13 = pneg %p1703_p10  ;;  %p1710_p9 = por %p1709_p7, %p1708_p3 }
  0x46   : > { %p1711_p2 = pnand %p1710_p9, %p1704_p13 }
  0x48   : > { %1714 = shalt.err (!%p1711_p2)
}
  0x49   : > { %s1823_s30 = smov 128   ;;  %s1824_s22 = smov 8  }
  0x4a   : > { %1487 = dma.hbm_to_vmem [thread:$0]  (!%p1950_p11), %s1948_s4, 2048, %s1954_s25, %s1956_s5, %s1823_s30, %s1823_s30, %s1824_s22  }
  0x4b   : > { %p2131_p0 = scmp.ne.s32.totalorder %s2126_s20, 0 }
  0x4c   : > { %s1987_s6 = sand.u32 (!%p2131_p0), 1, %s1809_s13   ;;  %p2132_p5 = scmp.ne.s32.totalorder (!%p2131_p0), %s2124_s18, 0 }
  0x4d   : > { %178 = sbr.rel (%p2131_p0) target bundleno = 485 (0x1e5), region = 28  ;;  %s1374_s7 = sshll.u32 (!%p2131_p0), %s1987_s6, 7 }
  0x4e   : > { %s181_s8 = scalar_lea.sflag (!%p2131_p0), [#allocation3], %s1987_s6  ;;  %s1991_s9 = scalar_lea.vmem (!%p2131_p0), [#allocation2], %s1374_s7 }
  0x54   : > { %1788 = dma.done.wait (%p2132_p5), %s181_s8, 2048  }
  0x55   : > { %1790 = vsyncadd (%p2132_p5), %s181_s8, 4294965248  ;;  %p2133_p11 = scmp.eq.s32.totalorder %s1869_s16, 0 }
  0x57   : > { %1792 = dma.done.wait (%p2133_p11), [#allocation6], 8192   ;;  %p2134_p1 = pmov %p2133_p11 }
  0x58   : > { %v1537_v0 = vld [vmem:[#allocation5 + $0x4] ss:$16 sps:$4 sm:$0xff]   ;;  %v1539_v1 = vld [vmem:[#allocation5 + $0xc] ss:$16 sps:$4 sm:$0xff]   ;;  %v1541_v2 = vld [vmem:[#allocation5] ss:$16 sps:$4 sm:$0xff]  }
  0x59   : > { %1794 = vsyncadd (%p2134_p1), [#allocation6], 4294959104  ;;  %697 = vmatprep.subr.bf16.mxu0 %v1537_v0  ;;  %v1542_v3 = vld [vmem:[#allocation5 + $0x8] ss:$16 sps:$4 sm:$0xff]   ;;  %810 = vmatprep.subr.bf16.mxu1 %v1539_v1  ;;  %v1543_v4 = vld [vmem:[#allocation5 + $0x24] ss:$16 sps:$4 sm:$0xff]  }
  0x5a   : > { %698 = vmatpush1.bf16.msra.mxu0 %v1541_v2  ;;  %811 = vmatpush1.bf16.msra.mxu1 %v1542_v3  ;;  %v1545_v5 = vld [vmem:[#allocation5 + $0x2c] ss:$16 sps:$4 sm:$0xff]   ;;  %v1547_v6 = vld [vmem:[#allocation5 + $0x20] ss:$16 sps:$4 sm:$0xff]   ;;  %v1548_v7 = vld [vmem:[#allocation5 + $0x28] ss:$16 sps:$4 sm:$0xff]  }
  0x5b   : > { %699 = vmatprep.subr.bf16.mxu0 %v1543_v4  ;;  %812 = vmatprep.subr.bf16.mxu1 %v1545_v5  ;;  %v1549_v8 = vld [vmem:[#allocation5 + $0x44] ss:$16 sps:$4 sm:$0xff]   ;;  %v1551_v9 = vld [vmem:[#allocation5 + $0x4c] ss:$16 sps:$4 sm:$0xff]   ;;  %v1553_v10 = vld [vmem:[#allocation5 + $0x40] ss:$16 sps:$4 sm:$0xff]  }
  0x5c   : > { %v1554_v11 = vld [vmem:[#allocation5 + $0x48] ss:$16 sps:$4 sm:$0xff]   ;;  %v1555_v12 = vld [vmem:[#allocation5 + $0x64] ss:$16 sps:$4 sm:$0xff]   ;;  %v1557_v13 = vld [vmem:[#allocation5 + $0x6c] ss:$16 sps:$4 sm:$0xff]  }
  0x5d   : > { %v1559_v14 = vld [vmem:[#allocation5 + $0x60] ss:$16 sps:$4 sm:$0xff]   ;;  %v1560_v15 = vld [vmem:[#allocation5 + $0x68] ss:$16 sps:$4 sm:$0xff]   ;;  %v1561_v16 = vld [vmem:[#allocation5 + $0x84] ss:$16 sps:$4 sm:$0xff]  }
  0x5e   : > { %700 = vmatpush1.bf16.msra.mxu0 %v1547_v6  ;;  %813 = vmatpush1.bf16.msra.mxu1 %v1548_v7  ;;  %v1563_v17 = vld [vmem:[#allocation5 + $0x8c] ss:$16 sps:$4 sm:$0xff]   ;;  %v1565_v18 = vld [vmem:[#allocation5 + $0x80] ss:$16 sps:$4 sm:$0xff]   ;;  %v1566_v19 = vld [vmem:[#allocation5 + $0x88] ss:$16 sps:$4 sm:$0xff]  }
  0x5f   : > { %701 = vmatprep.subr.bf16.mxu0 %v1549_v8  ;;  %814 = vmatprep.subr.bf16.mxu1 %v1551_v9  ;;  %v1567_v20 = vld [vmem:[#allocation5 + $0xa4] ss:$16 sps:$4 sm:$0xff]   ;;  %v1569_v21 = vld [vmem:[#allocation5 + $0xac] ss:$16 sps:$4 sm:$0xff]   ;;  %v1571_v22 = vld [vmem:[#allocation5 + $0xa0] ss:$16 sps:$4 sm:$0xff]  }
  0x60   : > { %v1572_v23 = vld [vmem:[#allocation5 + $0xa8] ss:$16 sps:$4 sm:$0xff]   ;;  %v1573_v24 = vld [vmem:[#allocation5 + $0xc4] ss:$16 sps:$4 sm:$0xff]   ;;  %v1575_v25 = vld [vmem:[#allocation5 + $0xcc] ss:$16 sps:$4 sm:$0xff]  }
  0x61   : > { %v1577_v26 = vld [vmem:[#allocation5 + $0xc0] ss:$16 sps:$4 sm:$0xff]   ;;  %v1578_v27 = vld [vmem:[#allocation5 + $0xc8] ss:$16 sps:$4 sm:$0xff]   ;;  %v1579_v28 = vld [vmem:[#allocation5 + $0xe4] ss:$16 sps:$4 sm:$0xff]  }
  0x62   : > { %702 = vmatpush1.bf16.msra.mxu0 %v1553_v10  ;;  %815 = vmatpush1.bf16.msra.mxu1 %v1554_v11  ;;  %v1581_v29 = vld [vmem:[#allocation5 + $0xec] ss:$16 sps:$4 sm:$0xff]   ;;  %v1583_v30 = vld [vmem:[#allocation5 + $0xe0] ss:$16 sps:$4 sm:$0xff]   ;;  %v1584_v31 = vld [vmem:[#allocation5 + $0xe8] ss:$16 sps:$4 sm:$0xff]  }
  0x63   : > { %703 = vmatprep.subr.bf16.mxu0 %v1555_v12  ;;  %816 = vmatprep.subr.bf16.mxu1 %v1557_v13  ;;  %v1585_v32 = vld [vmem:[#allocation5 + $0x104] ss:$16 sps:$4 sm:$0xff]   ;;  %v1587_v33 = vld [vmem:[#allocation5 + $0x10c] ss:$16 sps:$4 sm:$0xff]   ;;  %v1589_v34 = vld [vmem:[#allocation5 + $0x100] ss:$16 sps:$4 sm:$0xff]  }
  0x64   : > { %v1590_v35 = vld [vmem:[#allocation5 + $0x108] ss:$16 sps:$4 sm:$0xff]   ;;  %v1591_v36 = vld [vmem:[#allocation5 + $0x124] ss:$16 sps:$4 sm:$0xff]   ;;  %v1593_v37 = vld [vmem:[#allocation5 + $0x12c] ss:$16 sps:$4 sm:$0xff]  }
  0x65   : > { %v1595_v38 = vld [vmem:[#allocation5 + $0x120] ss:$16 sps:$4 sm:$0xff]   ;;  %v1596_v39 = vld [vmem:[#allocation5 + $0x128] ss:$16 sps:$4 sm:$0xff]   ;;  %v1597_v40 = vld [vmem:[#allocation5 + $0x144] ss:$16 sps:$4 sm:$0xff]  }
  0x66   : > { %704 = vmatpush1.bf16.msra.mxu0 %v1559_v14  ;;  %817 = vmatpush1.bf16.msra.mxu1 %v1560_v15  ;;  %v1599_v41 = vld [vmem:[#allocation5 + $0x14c] ss:$16 sps:$4 sm:$0xff]   ;;  %v1601_v42 = vld [vmem:[#allocation5 + $0x140] ss:$16 sps:$4 sm:$0xff]   ;;  %v1602_v43 = vld [vmem:[#allocation5 + $0x148] ss:$16 sps:$4 sm:$0xff]  }
  0x67   : > { %705 = vmatprep.subr.bf16.mxu0 %v1561_v16  ;;  %818 = vmatprep.subr.bf16.mxu1 %v1563_v17  ;;  %v1603_v44 = vld [vmem:[#allocation5 + $0x164] ss:$16 sps:$4 sm:$0xff]   ;;  %v1605_v45 = vld [vmem:[#allocation5 + $0x16c] ss:$16 sps:$4 sm:$0xff]   ;;  %v1607_v46 = vld [vmem:[#allocation5 + $0x160] ss:$16 sps:$4 sm:$0xff]  }
  0x68   : > { %v1608_v47 = vld [vmem:[#allocation5 + $0x168] ss:$16 sps:$4 sm:$0xff]   ;;  %v1635_v48 = vld [vmem:[%s1991_s9 + $0x4] ss:$8 sps:$4 sm:$0xff]   ;;  %v1613_v51 = vld [vmem:[#allocation5 + $0x180] ss:$16 sps:$4 sm:$0xff]  }
  0x69   : > { %v1609_v49 = vld [vmem:[#allocation5 + $0x184] ss:$16 sps:$4 sm:$0xff]   ;;  %v1611_v50 = vld [vmem:[#allocation5 + $0x18c] ss:$16 sps:$4 sm:$0xff]   ;;  %729 = vmatprep.mubr.bf16.mxu0 %v1635_v48  ;;  %842 = vmatprep.mubr.bf16.mxu1 %v1635_v48  ;;  %v1614_v52 = vld [vmem:[#allocation5 + $0x188] ss:$16 sps:$4 sm:$0xff]  }
  0x6a   : > { %706 = vmatpush1.bf16.msra.mxu0 %v1565_v18  ;;  %819 = vmatpush1.bf16.msra.mxu1 %v1566_v19  ;;  %v1615_v53 = vld [vmem:[#allocation5 + $0x1a4] ss:$16 sps:$4 sm:$0xff]   ;;  %v1617_v54 = vld [vmem:[#allocation5 + $0x1ac] ss:$16 sps:$4 sm:$0xff]   ;;  %v1619_v55 = vld [vmem:[#allocation5 + $0x1a0] ss:$16 sps:$4 sm:$0xff]  }
  0x6b   : > { %707 = vmatprep.subr.bf16.mxu0 %v1567_v20  ;;  %820 = vmatprep.subr.bf16.mxu1 %v1569_v21  ;;  %v1620_v56 = vld [vmem:[#allocation5 + $0x1a8] ss:$16 sps:$4 sm:$0xff]   ;;  %v1621_v57 = vld [vmem:[#allocation5 + $0x1c4] ss:$16 sps:$4 sm:$0xff]   ;;  %v1623_v58 = vld [vmem:[#allocation5 + $0x1cc] ss:$16 sps:$4 sm:$0xff]  }
  0x6c   : > { %v1625_v59 = vld [vmem:[#allocation5 + $0x1c0] ss:$16 sps:$4 sm:$0xff]   ;;  %v1626_v60 = vld [vmem:[#allocation5 + $0x1c8] ss:$16 sps:$4 sm:$0xff]   ;;  %v1627_v61 = vld [vmem:[#allocation5 + $0x1e4] ss:$16 sps:$4 sm:$0xff]  }
  0x6d   : > { %v1629_v62 = vld [vmem:[#allocation5 + $0x1ec] ss:$16 sps:$4 sm:$0xff]   ;;  %v1631_v63 = vld [vmem:[#allocation5 + $0x1e0] ss:$16 sps:$4 sm:$0xff]   ;;  %v1632_v0 = vld [vmem:[#allocation5 + $0x1e8] ss:$16 sps:$4 sm:$0xff]  }
  0x6e   : > { %708 = vmatpush1.bf16.msra.mxu0 %v1571_v22  ;;  %821 = vmatpush1.bf16.msra.mxu1 %v1572_v23  ;;  %v1633_v1 = vld [vmem:[%s1991_s9] ss:$8 sps:$4 sm:$0xff]   ;;  %v1636_v2 = vld [vmem:[%s1991_s9 + $0x14] ss:$8 sps:$4 sm:$0xff]   ;;  %v1638_v3 = vld [vmem:[%s1991_s9 + $0x10] ss:$8 sps:$4 sm:$0xff]  }
  0x6f   : > { %709 = vmatprep.subr.bf16.mxu0 %v1573_v24  ;;  %822 = vmatprep.subr.bf16.mxu1 %v1575_v25  ;;  %v1639_v4 = vld [vmem:[%s1991_s9 + $0x24] ss:$8 sps:$4 sm:$0xff]   ;;  %v1641_v5 = vld [vmem:[%s1991_s9 + $0x20] ss:$8 sps:$4 sm:$0xff]   ;;  %v1642_v6 = vld [vmem:[%s1991_s9 + $0x34] ss:$8 sps:$4 sm:$0xff]  }
  0x70   : > { %v1644_v7 = vld [vmem:[%s1991_s9 + $0x30] ss:$8 sps:$4 sm:$0xff]   ;;  %v1645_v8 = vld [vmem:[%s1991_s9 + $0x44] ss:$8 sps:$4 sm:$0xff]   ;;  %v1647_v9 = vld [vmem:[%s1991_s9 + $0x40] ss:$8 sps:$4 sm:$0xff]  }
  0x71   : > { %v1648_v10 = vld [vmem:[%s1991_s9 + $0x54] ss:$8 sps:$4 sm:$0xff]   ;;  %v1650_v11 = vld [vmem:[%s1991_s9 + $0x50] ss:$8 sps:$4 sm:$0xff]   ;;  %v1651_v12 = vld [vmem:[%s1991_s9 + $0x64] ss:$8 sps:$4 sm:$0xff]  }
  0x72   : > { %710 = vmatpush1.bf16.msra.mxu0 %v1577_v26  ;;  %823 = vmatpush1.bf16.msra.mxu1 %v1578_v27  ;;  %v1653_v13 = vld [vmem:[%s1991_s9 + $0x60] ss:$8 sps:$4 sm:$0xff]   ;;  %v1654_v14 = vld [vmem:[%s1991_s9 + $0x74] ss:$8 sps:$4 sm:$0xff]   ;;  %v1656_v15 = vld [vmem:[%s1991_s9 + $0x70] ss:$8 sps:$4 sm:$0xff]  }
  0x73   : > { %711 = vmatprep.subr.bf16.mxu0 %v1579_v28  ;;  %824 = vmatprep.subr.bf16.mxu1 %v1581_v29  ;;  %s1376_s18 = sshll.u32 %s1987_s6, 2  ;;  %s1468_s20 = sshll.u32 %s1869_s16, 6 }
  0x74   : > { %s208_s4 = scalar_lea.vmem [#allocation7], %s1376_s18  ;;  %s2033_s26 = scalar_lea.vmem [#allocation8], %s1376_s18 }
  0x75   : > { %s1239_s25 = sshll.u32 %s208_s4, 4  ;;  %s1253_s5 = sshll.u32 %s2033_s26, 4  ;;  %s2041_s25 = int_to_ptr.vmem [resolvable:$true] %s1239_s25  ;;  %s2050_s5 = int_to_ptr.vmem [resolvable:$true] %s1253_s5 }
  0x76   : > { %712 = vmatpush1.bf16.msra.mxu0 %v1583_v30  ;;  %825 = vmatpush1.bf16.msra.mxu1 %v1584_v31  ;;  %s2039_s16 = scalar_lea.hbm %s2119_s2, %s1468_s20  ;;  %s2048_s29 = scalar_lea.hbm %s2120_s3, %s1468_s20 }
  0x77   : > { %713 = vmatprep.subr.bf16.mxu0 %v1585_v32  ;;  %826 = vmatprep.subr.bf16.mxu1 %v1587_v33  ;;  %s1220_s23 = scalar_lea.sflag [#allocation4], %s1987_s6  ;;  %s1715_s30 = scalar_lea.vmem %s2041_s25, 64 }
  0x78   : > { %p1716_p4 = scmp.ne.s32.totalorder %s2041_s25, %s1715_s30  ;;  %s1826_s22 = smov [#allocation7]  }
  0x79   : > { %s1719_s7 = sshll.u32 %s1826_s22, 4  ;;  %s1720_s7 = int_to_ptr.vmem [resolvable:$false] %s1719_s7 }
  0x7a   : > { %714 = vmatpush1.bf16.msra.mxu0 %v1589_v34  ;;  %827 = vmatpush1.bf16.msra.mxu1 %v1590_v35  ;;  %p1717_p6 = pnand %p1716_p4, %p1939_p12  ;;  %s1721_s8 = scalar_lea.vmem %s1720_s7, 128 }
  0x7b   : > { %715 = vmatprep.subr.bf16.mxu0 %v1591_v36  ;;  %828 = vmatprep.subr.bf16.mxu1 %v1593_v37  ;;  %p1722_p10 = scmp.lt.s32.totalorder %s2041_s25, %s1720_s7  ;;  %p1723_p13 = scmp.lt.s32.totalorder %s1721_s8, %s1715_s30 }
  0x7c   : > { %p1718_p8 = pneg %p1717_p6 }
  0x7d   : > { %p1724_p3 = por %p1723_p13, %p1722_p10 }
  0x7e   : > { %716 = vmatpush1.bf16.msra.mxu0 %v1595_v38  ;;  %829 = vmatpush1.bf16.msra.mxu1 %v1596_v39 }
  0x7f   : > { %717 = vmatprep.subr.bf16.mxu0 %v1597_v40  ;;  %830 = vmatprep.subr.bf16.mxu1 %v1599_v41  ;;  %p1725_p7 = pnand %p1724_p3, %p1718_p8 }
  0x82   : > { %718 = vmatpush1.bf16.msra.mxu0 %v1601_v42  ;;  %831 = vmatpush1.bf16.msra.mxu1 %v1602_v43 }
  0x83   : > { %719 = vmatprep.subr.bf16.mxu0 %v1603_v44  ;;  %832 = vmatprep.subr.bf16.mxu1 %v1605_v45 }
  0x86   : > { %720 = vmatpush1.bf16.msra.mxu0 %v1607_v46  ;;  %833 = vmatpush1.bf16.msra.mxu1 %v1608_v47 }
  0x87   : > { %721 = vmatprep.subr.bf16.mxu0 %v1609_v49  ;;  %834 = vmatprep.subr.bf16.mxu1 %v1611_v50 }
  0x8a   : > { %722 = vmatpush1.bf16.msra.mxu0 %v1613_v51  ;;  %835 = vmatpush1.bf16.msra.mxu1 %v1614_v52 }
  0x8b   : > { %723 = vmatprep.subr.bf16.mxu0 %v1615_v53  ;;  %836 = vmatprep.subr.bf16.mxu1 %v1617_v54 }
  0x8e   : > { %724 = vmatpush1.bf16.msra.mxu0 %v1619_v55  ;;  %837 = vmatpush1.bf16.msra.mxu1 %v1620_v56 }
  0x8f   : > { %725 = vmatprep.subr.bf16.mxu0 %v1621_v57  ;;  %838 = vmatprep.subr.bf16.mxu1 %v1623_v58 }
  0x92   : > { %726 = vmatpush1.bf16.msra.mxu0 %v1625_v59  ;;  %839 = vmatpush1.bf16.msra.mxu1 %v1626_v60 }
  0x93   : > { %727 = vmatprep.subr.bf16.mxu0 %v1627_v61  ;;  %840 = vmatprep.subr.bf16.mxu1 %v1629_v62 }
  0x96   : > { %728 = vmatpush1.bf16.msra.mxu0 %v1631_v63  ;;  %841 = vmatpush1.bf16.msra.mxu1 %v1632_v0 }
  0x99   : > { %730 = vmatmul.mubr.bf16.vlgmr.msra.gmra.mrb[0].mxu0 %v1633_v1  ;;  %843 = vmatmul.mubr.bf16.vlgmr.msra.gmra.mrb[0].mxu1 %v1633_v1 }
  0x9a   : > { %739 = vmatprep.mubr.bf16.mxu0 %v1636_v2  ;;  %852 = vmatprep.mubr.bf16.mxu1 %v1636_v2 }
  0xa1   : > { %740 = vmatmul.mubr.bf16.gmra.mrb[4].mxu0 %v1638_v3  ;;  %853 = vmatmul.mubr.bf16.gmra.mrb[4].mxu1 %v1638_v3 }
  0xa2   : > { %749 = vmatprep.mubr.bf16.mxu0 %v1639_v4  ;;  %862 = vmatprep.mubr.bf16.mxu1 %v1639_v4 }
  0xa9   : > { %750 = vmatmul.mubr.bf16.gmra.mrb[8].mxu0 %v1641_v5  ;;  %863 = vmatmul.mubr.bf16.gmra.mrb[8].mxu1 %v1641_v5 }
  0xaa   : > { %759 = vmatprep.mubr.bf16.mxu0 %v1642_v6  ;;  %872 = vmatprep.mubr.bf16.mxu1 %v1642_v6 }
  0xb1   : > { %760 = vmatmul.mubr.bf16.gmra.mrb[12].mxu0 %v1644_v7  ;;  %873 = vmatmul.mubr.bf16.gmra.mrb[12].mxu1 %v1644_v7 }
  0xb2   : > { %769 = vmatprep.mubr.bf16.mxu0 %v1645_v8  ;;  %882 = vmatprep.mubr.bf16.mxu1 %v1645_v8 }
  0xb9   : > { %770 = vmatmul.mubr.bf16.gmra.mrb[16].mxu0 %v1647_v9  ;;  %883 = vmatmul.mubr.bf16.gmra.mrb[16].mxu1 %v1647_v9 }
  0xba   : > { %779 = vmatprep.mubr.bf16.mxu0 %v1648_v10  ;;  %892 = vmatprep.mubr.bf16.mxu1 %v1648_v10 }
  0xc1   : > { %780 = vmatmul.mubr.bf16.gmra.mrb[20].mxu0 %v1650_v11  ;;  %893 = vmatmul.mubr.bf16.gmra.mrb[20].mxu1 %v1650_v11 }
  0xc2   : > { %789 = vmatprep.mubr.bf16.mxu0 %v1651_v12  ;;  %902 = vmatprep.mubr.bf16.mxu1 %v1651_v12 }
  0xc9   : > { %790 = vmatmul.mubr.bf16.gmra.mrb[24].mxu0 %v1653_v13  ;;  %903 = vmatmul.mubr.bf16.gmra.mrb[24].mxu1 %v1653_v13 }
  0xca   : > { %799 = vmatprep.mubr.bf16.mxu0 %v1654_v14  ;;  %912 = vmatprep.mubr.bf16.mxu1 %v1654_v14 }
  0xd1   : > { %800 = vmatmul.mubr.bf16.gmra.mrb[28].mxu0 %v1656_v15  ;;  %913 = vmatmul.mubr.bf16.gmra.mrb[28].mxu1 %v1656_v15 }
 0x16c   : > { %v731_v16 = vpop.f32.mrb[0].mxu0  ;;  %v844_v17 = vpop.f32.mrb[0].mxu1 }
 0x16d   : > { %v733_v18 = vpop.f32.mrb[1].mxu0  ;;  %v846_v19 = vpop.f32.mrb[1].mxu1  ;;  %v1041_v20 = vmul.f32 %v731_v16, %v731_v16  ;;  %v1043_v21 = vmul.f32 %v844_v17, %v844_v17 }
 0x16e   : > { %v1042_v22 = vmul.f32 %v733_v18, %v733_v18  ;;  %v1044_v23 = vmul.f32 %v846_v19, %v846_v19  ;;  %v735_v24 = vpop.f32.mrb[2].mxu0  ;;  %v848_v25 = vpop.f32.mrb[2].mxu1 }
 0x16f   : > { %v923_v26 = vadd.f32 %v735_v24, %v731_v16  ;;  %v1045_v27 = vmul.f32 %v735_v24, %v735_v24  ;;  %v965_v28 = vadd.f32 %v848_v25, %v844_v17  ;;  %v1047_v29 = vmul.f32 %v848_v25, %v848_v25  ;;  %v737_v30 = vpop.f32.mrb[3].mxu0  ;;  %v850_v31 = vpop.f32.mrb[3].mxu1 }
 0x170   : > { %v944_v32 = vadd.f32 %v737_v30, %v733_v18  ;;  %v1046_v33 = vmul.f32 %v737_v30, %v737_v30  ;;  %v986_v34 = vadd.f32 %v850_v31, %v846_v19  ;;  %v1048_v35 = vmul.f32 %v850_v31, %v850_v31 }
 0x171   : > { %v1105_v36 = vadd.f32 %v1045_v27, %v1041_v20  ;;  %v1147_v37 = vadd.f32 %v1047_v29, %v1043_v21 }
 0x172   : > { %v1126_v38 = vadd.f32 %v1046_v33, %v1042_v22  ;;  %v1168_v39 = vadd.f32 %v1048_v35, %v1044_v23 }
 0x174   : > { %v741_v40 = vpop.f32.mrb[4].mxu0  ;;  %v854_v41 = vpop.f32.mrb[4].mxu1 }
 0x175   : > { %v924_v42 = vadd.f32 %v923_v26, %v741_v40  ;;  %v1049_v43 = vmul.f32 %v741_v40, %v741_v40  ;;  %v966_v44 = vadd.f32 %v965_v28, %v854_v41  ;;  %v1051_v45 = vmul.f32 %v854_v41, %v854_v41  ;;  %v743_v46 = vpop.f32.mrb[5].mxu0  ;;  %v856_v47 = vpop.f32.mrb[5].mxu1 }
 0x176   : > { %v945_v48 = vadd.f32 %v944_v32, %v743_v46  ;;  %v1050_v49 = vmul.f32 %v743_v46, %v743_v46  ;;  %v987_v50 = vadd.f32 %v986_v34, %v856_v47  ;;  %v1052_v51 = vmul.f32 %v856_v47, %v856_v47  ;;  %v745_v52 = vpop.f32.mrb[6].mxu0  ;;  %v858_v53 = vpop.f32.mrb[6].mxu1 }
 0x177   : > { %v1106_v54 = vadd.f32 %v1105_v36, %v1049_v43  ;;  %v1148_v55 = vadd.f32 %v1147_v37, %v1051_v45  ;;  %v925_v56 = vadd.f32 %v924_v42, %v745_v52  ;;  %v1053_v57 = vmul.f32 %v745_v52, %v745_v52  ;;  %v747_v58 = vpop.f32.mrb[7].mxu0  ;;  %v860_v59 = vpop.f32.mrb[7].mxu1 }
 0x178   : > { %v1127_v60 = vadd.f32 %v1126_v38, %v1050_v49  ;;  %v1169_v61 = vadd.f32 %v1168_v39, %v1052_v51  ;;  %v967_v62 = vadd.f32 %v966_v44, %v858_v53  ;;  %v1055_v63 = vmul.f32 %v858_v53, %v858_v53 }
 0x179   : > { %v1107_v0 = vadd.f32 %v1106_v54, %v1053_v57  ;;  %v946_v1 = vadd.f32 %v945_v48, %v747_v58  ;;  %v1054_v2 = vmul.f32 %v747_v58, %v747_v58  ;;  %v988_v3 = vadd.f32 %v987_v50, %v860_v59 }
 0x17a   : > { %v1149_v4 = vadd.f32 %v1148_v55, %v1055_v63  ;;  %v1056_v5 = vmul.f32 %v860_v59, %v860_v59 }
 0x17b   : > { %v1128_v6 = vadd.f32 %v1127_v60, %v1054_v2 }
 0x17c   : > { %v1170_v7 = vadd.f32 %v1169_v61, %v1056_v5  ;;  %v751_v8 = vpop.f32.mrb[8].mxu0  ;;  %v864_v9 = vpop.f32.mrb[8].mxu1 }
 0x17d   : > { %v926_v10 = vadd.f32 %v925_v56, %v751_v8  ;;  %v1057_v11 = vmul.f32 %v751_v8, %v751_v8  ;;  %v968_v12 = vadd.f32 %v967_v62, %v864_v9  ;;  %v1059_v13 = vmul.f32 %v864_v9, %v864_v9  ;;  %v753_v14 = vpop.f32.mrb[9].mxu0  ;;  %v866_v15 = vpop.f32.mrb[9].mxu1 }
 0x17e   : > { %v947_v16 = vadd.f32 %v946_v1, %v753_v14  ;;  %v1058_v17 = vmul.f32 %v753_v14, %v753_v14  ;;  %v989_v18 = vadd.f32 %v988_v3, %v866_v15  ;;  %v1060_v19 = vmul.f32 %v866_v15, %v866_v15  ;;  %v755_v20 = vpop.f32.mrb[10].mxu0  ;;  %v868_v21 = vpop.f32.mrb[10].mxu1 }
 0x17f   : > { %v1108_v22 = vadd.f32 %v1107_v0, %v1057_v11  ;;  %v1150_v23 = vadd.f32 %v1149_v4, %v1059_v13  ;;  %v927_v24 = vadd.f32 %v926_v10, %v755_v20  ;;  %v1061_v25 = vmul.f32 %v755_v20, %v755_v20  ;;  %v757_v26 = vpop.f32.mrb[11].mxu0  ;;  %v870_v27 = vpop.f32.mrb[11].mxu1 }
 0x180   : > { %v1129_v28 = vadd.f32 %v1128_v6, %v1058_v17  ;;  %v1171_v29 = vadd.f32 %v1170_v7, %v1060_v19  ;;  %v969_v30 = vadd.f32 %v968_v12, %v868_v21  ;;  %v1063_v31 = vmul.f32 %v868_v21, %v868_v21 }
 0x181   : > { %v1109_v32 = vadd.f32 %v1108_v22, %v1061_v25  ;;  %v948_v33 = vadd.f32 %v947_v16, %v757_v26  ;;  %v1062_v34 = vmul.f32 %v757_v26, %v757_v26  ;;  %v990_v35 = vadd.f32 %v989_v18, %v870_v27 }
 0x182   : > { %v1151_v36 = vadd.f32 %v1150_v23, %v1063_v31  ;;  %v1064_v37 = vmul.f32 %v870_v27, %v870_v27 }
 0x183   : > { %v1130_v38 = vadd.f32 %v1129_v28, %v1062_v34 }
 0x184   : > { %v1172_v39 = vadd.f32 %v1171_v29, %v1064_v37  ;;  %v761_v40 = vpop.f32.mrb[12].mxu0  ;;  %v874_v41 = vpop.f32.mrb[12].mxu1 }
 0x185   : > { %v928_v42 = vadd.f32 %v927_v24, %v761_v40  ;;  %v1065_v43 = vmul.f32 %v761_v40, %v761_v40  ;;  %v970_v44 = vadd.f32 %v969_v30, %v874_v41  ;;  %v1067_v45 = vmul.f32 %v874_v41, %v874_v41  ;;  %v763_v46 = vpop.f32.mrb[13].mxu0  ;;  %v876_v47 = vpop.f32.mrb[13].mxu1 }
 0x186   : > { %v949_v48 = vadd.f32 %v948_v33, %v763_v46  ;;  %v1066_v49 = vmul.f32 %v763_v46, %v763_v46  ;;  %v991_v50 = vadd.f32 %v990_v35, %v876_v47  ;;  %v1068_v51 = vmul.f32 %v876_v47, %v876_v47  ;;  %v765_v52 = vpop.f32.mrb[14].mxu0  ;;  %v878_v53 = vpop.f32.mrb[14].mxu1 }
 0x187   : > { %v1110_v54 = vadd.f32 %v1109_v32, %v1065_v43  ;;  %v1152_v55 = vadd.f32 %v1151_v36, %v1067_v45  ;;  %v929_v56 = vadd.f32 %v928_v42, %v765_v52  ;;  %v1069_v57 = vmul.f32 %v765_v52, %v765_v52  ;;  %v767_v58 = vpop.f32.mrb[15].mxu0  ;;  %v880_v59 = vpop.f32.mrb[15].mxu1 }
 0x188   : > { %v1131_v60 = vadd.f32 %v1130_v38, %v1066_v49  ;;  %v1173_v61 = vadd.f32 %v1172_v39, %v1068_v51  ;;  %v971_v62 = vadd.f32 %v970_v44, %v878_v53  ;;  %v1071_v63 = vmul.f32 %v878_v53, %v878_v53 }
 0x189   : > { %v1111_v0 = vadd.f32 %v1110_v54, %v1069_v57  ;;  %v950_v1 = vadd.f32 %v949_v48, %v767_v58  ;;  %v1070_v2 = vmul.f32 %v767_v58, %v767_v58  ;;  %v992_v3 = vadd.f32 %v991_v50, %v880_v59 }
 0x18a   : > { %v1153_v4 = vadd.f32 %v1152_v55, %v1071_v63  ;;  %v1072_v5 = vmul.f32 %v880_v59, %v880_v59 }
 0x18b   : > { %v1132_v6 = vadd.f32 %v1131_v60, %v1070_v2 }
 0x18c   : > { %v1174_v7 = vadd.f32 %v1173_v61, %v1072_v5  ;;  %v771_v8 = vpop.f32.mrb[16].mxu0  ;;  %v884_v9 = vpop.f32.mrb[16].mxu1 }
 0x18d   : > { %v930_v10 = vadd.f32 %v929_v56, %v771_v8  ;;  %v1073_v11 = vmul.f32 %v771_v8, %v771_v8  ;;  %v972_v12 = vadd.f32 %v971_v62, %v884_v9  ;;  %v1075_v13 = vmul.f32 %v884_v9, %v884_v9  ;;  %v773_v14 = vpop.f32.mrb[17].mxu0  ;;  %v886_v15 = vpop.f32.mrb[17].mxu1 }
 0x18e   : > { %v951_v16 = vadd.f32 %v950_v1, %v773_v14  ;;  %v1074_v17 = vmul.f32 %v773_v14, %v773_v14  ;;  %v993_v18 = vadd.f32 %v992_v3, %v886_v15  ;;  %v1076_v19 = vmul.f32 %v886_v15, %v886_v15  ;;  %v775_v20 = vpop.f32.mrb[18].mxu0  ;;  %v888_v21 = vpop.f32.mrb[18].mxu1 }
 0x18f   : > { %v1112_v22 = vadd.f32 %v1111_v0, %v1073_v11  ;;  %v1154_v23 = vadd.f32 %v1153_v4, %v1075_v13  ;;  %v931_v24 = vadd.f32 %v930_v10, %v775_v20  ;;  %v1077_v25 = vmul.f32 %v775_v20, %v775_v20  ;;  %v777_v26 = vpop.f32.mrb[19].mxu0  ;;  %v890_v27 = vpop.f32.mrb[19].mxu1 }
 0x190   : > { %v1133_v28 = vadd.f32 %v1132_v6, %v1074_v17  ;;  %v1175_v29 = vadd.f32 %v1174_v7, %v1076_v19  ;;  %v973_v30 = vadd.f32 %v972_v12, %v888_v21  ;;  %v1079_v31 = vmul.f32 %v888_v21, %v888_v21 }
 0x191   : > { %v1113_v32 = vadd.f32 %v1112_v22, %v1077_v25  ;;  %v952_v33 = vadd.f32 %v951_v16, %v777_v26  ;;  %v1078_v34 = vmul.f32 %v777_v26, %v777_v26  ;;  %v994_v35 = vadd.f32 %v993_v18, %v890_v27 }
 0x192   : > { %v1155_v36 = vadd.f32 %v1154_v23, %v1079_v31  ;;  %v1080_v37 = vmul.f32 %v890_v27, %v890_v27  ;;  %v1825_v10 = vmov 1966171168   ;;  %v1016_v12 = vlaneseq }
 0x193   : > { %v1134_v38 = vadd.f32 %v1133_v28, %v1078_v34  ;;  %v2017_v11 = vunpack.c.l.s4 %v1825_v10 }
 0x194   : > { %v1176_v39 = vadd.f32 %v1175_v29, %v1080_v37  ;;  %v781_v40 = vpop.f32.mrb[20].mxu0  ;;  %v894_v41 = vpop.f32.mrb[20].mxu1  ;;  %vm2029_vm0 = vcmp.lt.s32.totalorder %v1016_v12, 512 }
 0x195   : > { %v932_v42 = vadd.f32 %v931_v24, %v781_v40  ;;  %v1081_v43 = vmul.f32 %v781_v40, %v781_v40  ;;  %v974_v44 = vadd.f32 %v973_v30, %v894_v41  ;;  %v1083_v45 = vmul.f32 %v894_v41, %v894_v41  ;;  %v783_v46 = vpop.f32.mrb[21].mxu0  ;;  %v896_v47 = vpop.f32.mrb[21].mxu1 }
 0x196   : > { %v953_v48 = vadd.f32 %v952_v33, %v783_v46  ;;  %v1082_v49 = vmul.f32 %v783_v46, %v783_v46  ;;  %v995_v50 = vadd.f32 %v994_v35, %v896_v47  ;;  %v1084_v51 = vmul.f32 %v896_v47, %v896_v47  ;;  %v785_v52 = vpop.f32.mrb[22].mxu0  ;;  %v898_v53 = vpop.f32.mrb[22].mxu1 }
 0x197   : > { %v1114_v54 = vadd.f32 %v1113_v32, %v1081_v43  ;;  %v1156_v55 = vadd.f32 %v1155_v36, %v1083_v45  ;;  %v933_v56 = vadd.f32 %v932_v42, %v785_v52  ;;  %v1085_v57 = vmul.f32 %v785_v52, %v785_v52  ;;  %v787_v58 = vpop.f32.mrb[23].mxu0  ;;  %v900_v59 = vpop.f32.mrb[23].mxu1 }
 0x198   : > { %v1135_v60 = vadd.f32 %v1134_v38, %v1082_v49  ;;  %v1177_v61 = vadd.f32 %v1176_v39, %v1084_v51  ;;  %v975_v62 = vadd.f32 %v974_v44, %v898_v53  ;;  %v1087_v63 = vmul.f32 %v898_v53, %v898_v53 }
 0x199   : > { %v1115_v0 = vadd.f32 %v1114_v54, %v1085_v57  ;;  %v954_v1 = vadd.f32 %v953_v48, %v787_v58  ;;  %v1086_v2 = vmul.f32 %v787_v58, %v787_v58  ;;  %v996_v3 = vadd.f32 %v995_v50, %v900_v59 }
 0x19a   : > { %v1157_v4 = vadd.f32 %v1156_v55, %v1087_v63  ;;  %v1088_v5 = vmul.f32 %v900_v59, %v900_v59  ;;  %v1015_v45 = vunpack.c.0.s8 %v2017_v11  ;;  %v2021_v46 = vshrl.u32 %v1016_v12, 7 }
 0x19b   : > { %v1136_v6 = vadd.f32 %v1135_v60, %v1086_v2 }
 0x19c   : > { %v1178_v7 = vadd.f32 %v1177_v61, %v1088_v5  ;;  %v791_v8 = vpop.f32.mrb[24].mxu0  ;;  %v904_v9 = vpop.f32.mrb[24].mxu1 }
 0x19d   : > { %v934_v13 = vadd.f32 %v933_v56, %v791_v8  ;;  %v1089_v14 = vmul.f32 %v791_v8, %v791_v8  ;;  %v976_v15 = vadd.f32 %v975_v62, %v904_v9  ;;  %v1091_v16 = vmul.f32 %v904_v9, %v904_v9  ;;  %v793_v17 = vpop.f32.mrb[25].mxu0  ;;  %v906_v18 = vpop.f32.mrb[25].mxu1 }
 0x19e   : > { %v955_v19 = vadd.f32 %v954_v1, %v793_v17  ;;  %v1090_v20 = vmul.f32 %v793_v17, %v793_v17  ;;  %v997_v21 = vadd.f32 %v996_v3, %v906_v18  ;;  %v1092_v22 = vmul.f32 %v906_v18, %v906_v18  ;;  %v795_v23 = vpop.f32.mrb[26].mxu0  ;;  %v908_v24 = vpop.f32.mrb[26].mxu1 }
 0x19f   : > { %v1116_v25 = vadd.f32 %v1115_v0, %v1089_v14  ;;  %v1158_v26 = vadd.f32 %v1157_v4, %v1091_v16  ;;  %v935_v27 = vadd.f32 %v934_v13, %v795_v23  ;;  %v1093_v28 = vmul.f32 %v795_v23, %v795_v23  ;;  %v797_v29 = vpop.f32.mrb[27].mxu0  ;;  %v910_v30 = vpop.f32.mrb[27].mxu1 }
 0x1a0   : > { %v1137_v31 = vadd.f32 %v1136_v6, %v1090_v20  ;;  %v1179_v32 = vadd.f32 %v1178_v7, %v1092_v22  ;;  %v977_v33 = vadd.f32 %v976_v15, %v908_v24  ;;  %v1095_v34 = vmul.f32 %v908_v24, %v908_v24 }
 0x1a1   : > { %v1117_v35 = vadd.f32 %v1116_v25, %v1093_v28  ;;  %v956_v36 = vadd.f32 %v955_v19, %v797_v29  ;;  %v1094_v37 = vmul.f32 %v797_v29, %v797_v29  ;;  %v998_v38 = vadd.f32 %v997_v21, %v910_v30 }
 0x1a2   : > { %v1159_v39 = vadd.f32 %v1158_v26, %v1095_v34  ;;  %v1096_v40 = vmul.f32 %v910_v30, %v910_v30 }
 0x1a3   : > { %v1138_v41 = vadd.f32 %v1137_v31, %v1094_v37 }
 0x1a4   : > { %v1180_v42 = vadd.f32 %v1179_v32, %v1096_v40  ;;  %v801_v43 = vpop.f32.mrb[28].mxu0  ;;  %v914_v44 = vpop.f32.mrb[28].mxu1 }
 0x1a5   : > { %v936_v47 = vadd.f32 %v935_v27, %v801_v43  ;;  %v1097_v48 = vmul.f32 %v801_v43, %v801_v43  ;;  %v978_v49 = vadd.f32 %v977_v33, %v914_v44  ;;  %v1099_v50 = vmul.f32 %v914_v44, %v914_v44  ;;  %v803_v51 = vpop.f32.mrb[29].mxu0  ;;  %v916_v52 = vpop.f32.mrb[29].mxu1 }
 0x1a6   : > { %v957_v53 = vadd.f32 %v956_v36, %v803_v51  ;;  %v1098_v54 = vmul.f32 %v803_v51, %v803_v51  ;;  %v999_v55 = vadd.f32 %v998_v38, %v916_v52  ;;  %v1100_v56 = vmul.f32 %v916_v52, %v916_v52  ;;  %v805_v57 = vpop.f32.mrb[30].mxu0  ;;  %v918_v58 = vpop.f32.mrb[30].mxu1 }
 0x1a7   : > { %v1118_v59 = vadd.f32 %v1117_v35, %v1097_v48  ;;  %v1160_v60 = vadd.f32 %v1159_v39, %v1099_v50  ;;  %v937_v61 = vadd.f32 %v936_v47, %v805_v57  ;;  %v1101_v62 = vmul.f32 %v805_v57, %v805_v57  ;;  %v807_v63 = vpop.f32.mrb[31].mxu0  ;;  %v920_v0 = vpop.f32.mrb[31].mxu1 }
 0x1a8   : > { %v1139_v1 = vadd.f32 %v1138_v41, %v1098_v54  ;;  %v1181_v2 = vadd.f32 %v1180_v42, %v1100_v56  ;;  %v979_v3 = vadd.f32 %v978_v49, %v918_v58  ;;  %v1103_v4 = vmul.f32 %v918_v58, %v918_v58 }
 0x1a9   : > { %v938_v5 = vrot.slane %v937_v61, 4  ;;  %v1119_v6 = vadd.f32 %v1118_v59, %v1101_v62  ;;  %v958_v7 = vadd.f32 %v957_v53, %v807_v63  ;;  %v1102_v8 = vmul.f32 %v807_v63, %v807_v63 }
 0x1aa   : > { %v980_v9 = vrot.slane %v979_v3, 4  ;;  %v1161_v10 = vadd.f32 %v1160_v60, %v1103_v4  ;;  %v1000_v13 = vadd.f32 %v999_v55, %v920_v0  ;;  %v1104_v14 = vmul.f32 %v920_v0, %v920_v0 }
 0x1ab   : > { %v939_v15 = vadd.f32 %v938_v5, %v937_v61  ;;  %v1120_v16 = vrot.slane %v1119_v6, 4  ;;  %v959_v17 = vrot.slane %v958_v7, 4  ;;  %v1140_v18 = vadd.f32 %v1139_v1, %v1102_v8 }
 0x1ac   : > { %v981_v19 = vadd.f32 %v980_v9, %v979_v3  ;;  %v1162_v20 = vrot.slane %v1161_v10, 4  ;;  %v1001_v21 = vrot.slane %v1000_v13, 4  ;;  %v1182_v22 = vadd.f32 %v1181_v2, %v1104_v14 }
 0x1ad   : > { %v940_v23 = vrot.slane %v939_v15, 2  ;;  %v1121_v24 = vadd.f32 %v1120_v16, %v1119_v6  ;;  %v960_v25 = vadd.f32 %v959_v17, %v958_v7  ;;  %v1141_v26 = vrot.slane %v1140_v18, 4 }
 0x1ae   : > { %v982_v27 = vrot.slane %v981_v19, 2  ;;  %v1163_v28 = vadd.f32 %v1162_v20, %v1161_v10  ;;  %v1002_v29 = vadd.f32 %v1001_v21, %v1000_v13  ;;  %v1183_v30 = vrot.slane %v1182_v22, 4 }
 0x1af   : > { %v941_v31 = vadd.f32 %v940_v23, %v939_v15  ;;  %v1122_v32 = vrot.slane %v1121_v24, 2  ;;  %v961_v33 = vrot.slane %v960_v25, 2  ;;  %v1142_v34 = vadd.f32 %v1141_v26, %v1140_v18 }
 0x1b0   : > { %v983_v35 = vadd.f32 %v982_v27, %v981_v19  ;;  %v1164_v36 = vrot.slane %v1163_v28, 2  ;;  %v1003_v37 = vrot.slane %v1002_v29, 2  ;;  %v1184_v38 = vadd.f32 %v1183_v30, %v1182_v22 }
 0x1b1   : > { %v942_v39 = vrot.slane %v941_v31, 1  ;;  %v1123_v40 = vadd.f32 %v1122_v32, %v1121_v24  ;;  %v962_v41 = vadd.f32 %v961_v33, %v960_v25  ;;  %v1143_v42 = vrot.slane %v1142_v34, 2 }
 0x1b2   : > { %v984_v43 = vrot.slane %v983_v35, 1  ;;  %v1165_v44 = vadd.f32 %v1164_v36, %v1163_v28  ;;  %v1004_v47 = vadd.f32 %v1003_v37, %v1002_v29  ;;  %v1185_v48 = vrot.slane %v1184_v38, 2 }
 0x1b3   : > { %v943_v49 = vadd.f32 %v942_v39, %v941_v31  ;;  %v1124_v50 = vrot.slane %v1123_v40, 1  ;;  %v963_v51 = vrot.slane %v962_v41, 1  ;;  %v1144_v52 = vadd.f32 %v1143_v42, %v1142_v34 }
 0x1b4   : > { %v985_v53 = vadd.f32 %v984_v43, %v983_v35  ;;  %v1166_v54 = vrot.slane %v1165_v44, 1  ;;  %v1005_v55 = vrot.slane %v1004_v47, 1  ;;  %v1186_v56 = vadd.f32 %v1185_v48, %v1184_v38 }
 0x1b5   : > { %v1125_v57 = vadd.f32 %v1124_v50, %v1123_v40  ;;  %v964_v58 = vadd.f32 %v963_v51, %v962_v41  ;;  %v1018_v59 = vsub.s32 %v1015_v45, %v2021_v46  ;;  %v1145_v60 = vrot.slane %v1144_v52, 1 }
 0x1b6   : > { %v1167_v61 = vadd.f32 %v1166_v54, %v1165_v44  ;;  %v1006_v62 = vadd.f32 %v1005_v55, %v1004_v47  ;;  %v1187_v63 = vrot.slane %v1186_v56, 1 }
 0x1b7   : > { %v1011_v0 = vcombine.low %v943_v49, %v964_v58  ;;  %v1146_v1 = vadd.f32 %v1145_v60, %v1144_v52 }
 0x1b8   : > { %v1012_v2 = vcombine.low %v985_v53, %v1006_v62  ;;  %v1188_v3 = vadd.f32 %v1187_v63, %v1186_v56 }
 0x1b9   : > { %v1019_v4 = vrot.slane %v1011_v0, %v1018_v59  ;;  %v1193_v5 = vcombine.low %v1125_v57, %v1146_v1 }
 0x1ba   : > { %v1026_v6 = vrot.slane %v1012_v2, %v1018_v59  ;;  %v1194_v7 = vcombine.low %v1167_v61, %v1188_v3 }
 0x1bb   : > { %v1201_v8 = vrot.slane %v1193_v5, %v1018_v59 }
 0x1bc   : > { %v1027_v11 = vcombine.low %v1019_v4, %v1026_v6  ;;  %v1208_v45 = vrot.slane %v1194_v7, %v1018_v59 }
 0x1be   : > { %v1209_v9 = vcombine.low %v1201_v8, %v1208_v45  ;;  %v1034_v10 = vrot.slane %v1027_v11, %v1018_v59 }
 0x1c0   : > { %1040 = vst.msk [vmem:[%s208_s4] sm:$0xf] %vm2029_vm0, %v1034_v10  ;;  %v1216_v12 = vrot.slane %v1209_v9, %v1018_v59 }
 0x1c1   : > { %1728 = shalt.err (!%p1725_p7)
}
 0x1c2   : > { %s1729_s9 = scalar_lea.hbm %s2039_s16, 64  ;;  %s1733_s4 = scalar_lea.hbm %s2119_s2, 128 }
 0x1c3   : > { %p1730_p9 = scmp.ne.s32.totalorder %s2039_s16, %s1729_s9  ;;  %p1734_p5 = scmp.lt.u32.totalorder %s2039_s16, %s2119_s2 }
 0x1c4   : > { %p1735_p11 = scmp.lt.u32.totalorder %s1733_s4, %s1729_s9  ;;  %p1737_p4 = scmp.lt.u32.totalorder %s1729_s9, %s2039_s16 }
 0x1c5   : > { %p1731_p2 = pnand %p1730_p9, %p1939_p12 }
 0x1c6   : > { %p1736_p1 = por %p1735_p11, %p1734_p5 }
 0x1c7   : > { %p1732_p0 = pneg %p1731_p2 }
 0x1c8   : > { %p1738_p6 = por %p1737_p4, %p1736_p1 }
 0x1ca   : > { %p1739_p8 = pnand %p1738_p6, %p1732_p0 }
 0x1cc   : > { %1742 = shalt.err (!%p1739_p8)
}
 0x1cd   : > { %1476 = dma.vmem_to_hbm [thread:$0]  (%p1939_p12), %s2041_s25, 64, %s2039_s16, %s1220_s23   ;;  %1218 = vst.msk [vmem:[%s2033_s26] sm:$0xf] %vm2029_vm0, %v1216_v12 }
 0x1ce   : > { %s1225_s27 = scalar_lea.sflag [#allocation9], %s1987_s6  ;;  %s1743_s28 = scalar_lea.vmem %s2050_s5, 64 }
 0x1cf   : > { %p1744_p10 = scmp.ne.s32.totalorder %s2050_s5, %s1743_s28  ;;  %s1827_s30 = smov [#allocation8]  }
 0x1d0   : > { %s1747_s22 = sshll.u32 %s1827_s30, 4  ;;  %s1748_s22 = int_to_ptr.vmem [resolvable:$false] %s1747_s22 }
 0x1d1   : > { %p1745_p13 = pnand %p1744_p10, %p1939_p12  ;;  %s1749_s7 = scalar_lea.vmem %s1748_s22, 128 }
 0x1d2   : > { %p1750_p7 = scmp.lt.s32.totalorder %s2050_s5, %s1748_s22  ;;  %p1751_p9 = scmp.lt.s32.totalorder %s1749_s7, %s1743_s28 }
 0x1d3   : > { %p1746_p3 = pneg %p1745_p13 }
 0x1d4   : > { %p1752_p2 = por %p1751_p9, %p1750_p7 }
 0x1d6   : > { %p1753_p0 = pnand %p1752_p2, %p1746_p3 }
 0x1d8   : > { %1756 = shalt.err (!%p1753_p0)
}
 0x1d9   : > { %s1757_s6 = scalar_lea.hbm %s2048_s29, 64  ;;  %s1761_s16 = scalar_lea.hbm %s2120_s3, 128 }
 0x1da   : > { %p1758_p5 = scmp.ne.s32.totalorder %s2048_s29, %s1757_s6  ;;  %p1762_p4 = scmp.lt.u32.totalorder %s2048_s29, %s2120_s3 }
 0x1db   : > { %p1763_p6 = scmp.lt.u32.totalorder %s1761_s16, %s1757_s6  ;;  %p1765_p10 = scmp.lt.u32.totalorder %s1757_s6, %s2048_s29 }
 0x1dc   : > { %p1759_p11 = pnand %p1758_p5, %p1939_p12 }
 0x1dd   : > { %p1764_p8 = por %p1763_p6, %p1762_p4 }
 0x1de   : > { %p1760_p1 = pneg %p1759_p11 }
 0x1df   : > { %p1766_p13 = por %p1765_p10, %p1764_p8 }
 0x1e1   : > { %p1767_p3 = pnand %p1766_p13, %p1760_p1 }
 0x1e3   : > { %1770 = shalt.err (!%p1767_p3)
}
 0x1e4   : > { %1477 = dma.vmem_to_hbm [thread:$0]  (%p1939_p12), %s2050_s5, 64, %s2048_s29, %s1225_s27  }
 0x1e5 PF: > { %s1265_s9 = sand.u32 1, %s1805_s12   ;;  %p2137_p7 = scmp.ne.s32.totalorder %s2125_s19, 0 }
 0x1e6   : > { %p2138_p9 = scmp.ge.s32.totalorder %s1817_s15, 2  ;;  %s1266_s18 = scalar_lea.sflag [#allocation4], %s1265_s9 }
 0x1e8   : > { %p1489_p2 = pnand %p2138_p9, %p2137_p7 }
 0x1ea   : > { %1796 = dma.done.wait (!%p1489_p2), %s1266_s18, 64  }
 0x1eb   : > { %1798 = vsyncadd (!%p1489_p2), %s1266_s18, 4294967232  ;;  %s1275_s20 = scalar_lea.sflag [#allocation9], %s1265_s9 }
 0x1ec   : > { %1800 = dma.done.wait (!%p1489_p2), %s1275_s20, 64  }
 0x1ed   : > { %1802 = vsyncadd (!%p1489_p2), %s1275_s20, 4294967232  ;;  %p21_p12 = scmp.ge.s32.totalorder %s1904_s24, 4   ;;  %s2139_s12 = smov %s1809_s13 }
 0x1ee   : > { %s2140_s13 = smov %s1813_s14  ;;  %s2141_s14 = smov %s1935_s17 }
 0x1ef   : > { %s2142_s15 = smov %s1904_s24  ;;  %23 = sbr.rel (!%p21_p12) target bundleno = 8 (0x8), region = 94 }
 0x1f6   :  { %1280 = vsyncpa [#allocation3], 1 }
 0x1f7   :  { %1282 = vsyncpa [#allocation3 + $0x1], 1 }
 0x1f8   :  { %1283 = vsyncpa [#allocation6], 1 }
 0x1f9   :  { %1284 = vsyncpa [#allocation4], 1 }
 0x1fa   :  { %1286 = vsyncpa [#allocation4 + $0x1], 1 }
 0x1fb   :  { %1287 = vsyncpa [#allocation9], 1 }
 0x1fc   :  { %1289 = vsyncpa [#allocation9 + $0x1], 1 }

</bundles_post_ra>
